<compile_context>
chip_gen: v6e
topology: v6e:2x2x1
jax: 0.10.0
libtpu: 0.0.40
codegen_flags: <defaults>
</compile_context>

<pallas_src>
import jax
import jax.numpy as jnp
from jax import lax
from jax.experimental import pallas as pl
from jax.experimental.pallas import tpu as pltpu

# ---- model hyper-parameters (small, synthetic "config") ---------------------
B = 2            # batch
S = 8            # sequence length
H = 32           # hidden size
NUM_HEADS = 2
DH = H // NUM_HEADS
FFN = 64
VOCAB = 100
NUM_LAYERS = 2
NUM_SENTIMENT = 2        # sentiment_head: Linear(H, 2)
NUM_EMOTION = 6          # emotion_head:  Linear(H, len(df['emotion'].unique()))
HEAD_PAD = 128           # lane-dense padded output width for the fused heads matmul
LN_EPS = 1e-12
ATTN_SCALE = 1.0 / (DH ** 0.5)

# ---- packed per-layer vector slab: one 128-lane row per bias/gamma/beta -----
ROW_BQ = 0                       # rows [0, NH)    : per-head Q bias   (DH wide)
ROW_BK = NUM_HEADS               # rows [NH, 2NH)  : per-head K bias
ROW_BV = 2 * NUM_HEADS           # rows [2NH, 3NH) : per-head V bias
ROW_BO = 3 * NUM_HEADS           # attention output-projection bias (H wide)
ROW_G1 = ROW_BO + 1              # LayerNorm1 gamma
ROW_BE1 = ROW_BO + 2             # LayerNorm1 beta
ROW_B1 = ROW_BO + 3              # FFN intermediate bias (FFN wide)
ROW_B2 = ROW_BO + 4              # FFN output bias
ROW_G2 = ROW_BO + 5              # LayerNorm2 gamma
ROW_BE2 = ROW_BO + 6             # LayerNorm2 beta
NVEC = 16                        # rows per layer (padded to a sublane multiple)


def _layer_norm(x, gamma, beta):
    mu = jnp.mean(x, axis=-1, keepdims=True)
    var = jnp.mean((x - mu) * (x - mu), axis=-1, keepdims=True)
    return (x - mu) * lax.rsqrt(var + LN_EPS) * gamma + beta


# ---- Pallas kernel: one grid step == one encoder layer ----------------------
def fused_layer_kernel(x_ref, neg_ref, wattn_ref, wffn_ref, vec_ref, head_ref,
                       logits_ref, xs_ref):
    l = pl.program_id(0)

    @pl.when(l == 0)
    def _():
        xs_ref[...] = x_ref[...]          # load embeddings into the resident hidden state

    x = xs_ref[...]                       # (B*S, H) hidden state (VMEM-resident scratch)
    neg = neg_ref[...][:, None, :]        # (B, 1, S) additive attention mask
    V = vec_ref[0]                        # (NVEC, 128) packed bias/gamma/beta rows

    # ---- self-attention: per-head weights (leading-axis indexing only),
    #      batched-over-B score / softmax / context ----
    acc = None
    for h in range(NUM_HEADS):            # NH=2, static; no lane-dim slicing anywhere
        bq = V[ROW_BQ + h:ROW_BQ + h + 1, :DH]
        bk = V[ROW_BK + h:ROW_BK + h + 1, :DH]
        bv = V[ROW_BV + h:ROW_BV + h + 1, :DH]
        qh = (jnp.dot(x, wattn_ref[0, 0 * NUM_HEADS + h],
                      preferred_element_type=jnp.float32) + bq).reshape(B, S, DH)
        kh = (jnp.dot(x, wattn_ref[0, 1 * NUM_HEADS + h],
                      preferred_element_type=jnp.float32) + bk).reshape(B, S, DH)
        vh = (jnp.dot(x, wattn_ref[0, 2 * NUM_HEADS + h],
                      preferred_element_type=jnp.float32) + bv).reshape(B, S, DH)

        s = jnp.einsum("bqd,bkd->bqk", qh, kh,
                       preferred_element_type=jnp.float32) * ATTN_SCALE + neg
        s = s - jnp.max(s, axis=-1, keepdims=True)
        p = jnp.exp(s)
        p = p / jnp.sum(p, axis=-1, keepdims=True)      # exact softmax denominator
        ctx = jnp.einsum("bqk,bkd->bqd", p, vh,
                         preferred_element_type=jnp.float32).reshape(B * S, DH)

        # Wo is stored transposed per head as (H, DH): contract the DH dims.
        contrib = lax.dot_general(ctx, wattn_ref[0, 3 * NUM_HEADS + h],
                                  (((1,), (1,)), ((), ())),
                                  preferred_element_type=jnp.float32)    # (B*S, H)
        acc = contrib if acc is None else acc + contrib

    attn = acc + V[ROW_BO:ROW_BO + 1, :H]
    x = _layer_norm(x + attn, V[ROW_G1:ROW_G1 + 1, :H], V[ROW_BE1:ROW_BE1 + 1, :H])

    # ---- feed-forward block ----
    h1 = jnp.dot(x, wffn_ref[0, 0],
                 preferred_element_type=jnp.float32) + V[ROW_B1:ROW_B1 + 1, :FFN]
    h1 = jax.nn.gelu(h1, approximate=True)   # TODO(synk): HF BERT uses exact erf GELU
    # W2 is stored transposed as (H, FFN): contract the FFN dims.
    h2 = lax.dot_general(h1, wffn_ref[0, 1], (((1,), (1,)), ((), ())),
                         preferred_element_type=jnp.float32) + V[ROW_B2:ROW_B2 + 1, :H]
    x = _layer_norm(x + h2, V[ROW_G2:ROW_G2 + 1, :H], V[ROW_BE2:ROW_BE2 + 1, :H])

    xs_ref[...] = x                        # carry hidden state to the next layer step

    # ---- last layer: CLS rows -> fused, lane-padded classification heads ----
    @pl.when(l == NUM_LAYERS - 1)
    def _():
        # hidden_states[-1][:, 0, :] == rows 0, S, 2S, ... -> one strided sublane read.
        cls = xs_ref[pl.ds(0, B, stride=S), :]            # (B, H)
        hs = head_ref[...]                                # (H+8, HEAD_PAD)
        logits_ref[...] = (jnp.dot(cls, hs[:H, :],
                                   preferred_element_type=jnp.float32)
                           + hs[H:H + 1, :])              # single unmasked (B,128) store


def fused_forward(x_flat, neg_mask, w_attn, w_ffn, vecs, head_slab):
    grid_spec = pltpu.PrefetchScalarGridSpec(
        num_scalar_prefetch=0,
        grid=(NUM_LAYERS,),
        in_specs=[
            pl.BlockSpec((B * S, H), lambda l: (0, 0)),                    # embeddings
            pl.BlockSpec((B, S), lambda l: (0, 0)),                        # additive mask
            pl.BlockSpec((1, 4 * NUM_HEADS, H, DH), lambda l: (l, 0, 0, 0)),  # attn weights
            pl.BlockSpec((1, 2, H, FFN), lambda l: (l, 0, 0, 0)),          # FFN weights
            pl.BlockSpec((1, NVEC, 128), lambda l: (l, 0, 0)),             # bias/LN slab
            pl.BlockSpec((H + 8, HEAD_PAD), lambda l: (0, 0)),             # fused heads
        ],
        out_specs=pl.BlockSpec((B, HEAD_PAD), lambda l: (0, 0)),
        scratch_shapes=[pltpu.VMEM((B * S, H), jnp.float32)],              # hidden state
    )
    return pl.pallas_call(
        fused_layer_kernel,
        out_shape=jax.ShapeDtypeStruct((B, HEAD_PAD), jnp.float32),
        grid_spec=grid_spec,
        compiler_params=pltpu.CompilerParams(dimension_semantics=("arbitrary",)),
    )(x_flat, neg_mask, w_attn, w_ffn, vecs, head_slab)


# ---- deterministic parameter construction -----------------------------------
def init_params(key):
    # TODO(synk): real module loads pretrained HF weights; here weights are synthetic
    # deterministic initializations with the same shapes/structure.
    def normal(k, shape, scale=0.02):
        return scale * jax.random.normal(k, shape, dtype=jnp.float32)

    keys = jax.random.split(key, 6 + NUM_LAYERS)
    params = {
        "word_emb": normal(keys[0], (VOCAB, H)),
        "pos_emb": normal(keys[1], (S, H)),
        "emb_gamma": jnp.ones((1, 1, H), jnp.float32),
        "emb_beta": jnp.zeros((1, 1, H), jnp.float32),
    }

    # Fused classification heads + bias packed into one lane-dense slab:
    # rows [0:H] = [W_sentiment | W_emotion | zero-pad], row H = bias row.
    ws = normal(keys[2], (H, NUM_SENTIMENT))
    we = normal(keys[3], (H, NUM_EMOTION))
    bs = normal(keys[4], (NUM_SENTIMENT,))
    be = normal(keys[5], (NUM_EMOTION,))
    head_slab = jnp.zeros((H + 8, HEAD_PAD), jnp.float32)
    head_slab = head_slab.at[:H, :NUM_SENTIMENT].set(ws)
    head_slab = head_slab.at[:H, NUM_SENTIMENT:NUM_SENTIMENT + NUM_EMOTION].set(we)
    head_slab = head_slab.at[H, :NUM_SENTIMENT].set(bs)
    head_slab = head_slab.at[H, NUM_SENTIMENT:NUM_SENTIMENT + NUM_EMOTION].set(be)
    params["head_slab"] = head_slab

    # Per-layer weights packed into three slabs (layer axis leading -> streamed
    # per grid step and double-buffered by BlockSpec).
    w_attn = jnp.zeros((NUM_LAYERS, 4 * NUM_HEADS, H, DH), jnp.float32)
    w_ffn = jnp.zeros((NUM_LAYERS, 2, H, FFN), jnp.float32)
    vecs = jnp.zeros((NUM_LAYERS, NVEC, 128), jnp.float32)
    for layer in range(NUM_LAYERS):
        lk = jax.random.split(keys[6 + layer], 12)
        wq = normal(lk[0], (H, H));  wk = normal(lk[1], (H, H))
        wv = normal(lk[2], (H, H));  wo = normal(lk[3], (H, H))
        bq = normal(lk[4], (H,));    bk = normal(lk[5], (H,))
        bv = normal(lk[6], (H,));    bo = normal(lk[7], (H,))
        w1 = normal(lk[8], (H, FFN));   b1 = normal(lk[9], (FFN,))
        w2 = normal(lk[10], (FFN, H));  b2 = normal(lk[11], (H,))
        g1 = jnp.ones((H,), jnp.float32);  be1 = jnp.zeros((H,), jnp.float32)
        g2 = jnp.ones((H,), jnp.float32);  be2 = jnp.zeros((H,), jnp.float32)

        for h in range(NUM_HEADS):
            cs = slice(h * DH, (h + 1) * DH)
            w_attn = w_attn.at[layer, 0 * NUM_HEADS + h].set(wq[:, cs])      # (H, DH)
            w_attn = w_attn.at[layer, 1 * NUM_HEADS + h].set(wk[:, cs])
            w_attn = w_attn.at[layer, 2 * NUM_HEADS + h].set(wv[:, cs])
            w_attn = w_attn.at[layer, 3 * NUM_HEADS + h].set(wo[cs, :].T)    # Wo rows, transposed
            vecs = vecs.at[layer, ROW_BQ + h, :DH].set(bq[cs])
            vecs = vecs.at[layer, ROW_BK + h, :DH].set(bk[cs])
            vecs = vecs.at[layer, ROW_BV + h, :DH].set(bv[cs])
        w_ffn = w_ffn.at[layer, 0].set(w1)
        w_ffn = w_ffn.at[layer, 1].set(w2.T)                                 # W2 transposed
        vecs = vecs.at[layer, ROW_BO, :H].set(bo)
        vecs = vecs.at[layer, ROW_G1, :H].set(g1)
        vecs = vecs.at[layer, ROW_BE1, :H].set(be1)
        vecs = vecs.at[layer, ROW_B1, :FFN].set(b1)
        vecs = vecs.at[layer, ROW_B2, :H].set(b2)
        vecs = vecs.at[layer, ROW_G2, :H].set(g2)
        vecs = vecs.at[layer, ROW_BE2, :H].set(be2)

    params["w_attn"] = w_attn
    params["w_ffn"] = w_ffn
    params["vecs"] = vecs
    return params


# ---- full forward (mirrors MultiTaskModel.forward) ---------------------------
def multitask_forward(params, input_ids, attention_mask):
    # Embedding lookup + embedding LayerNorm (plain-JAX glue).
    # TODO(synk): token_type embeddings of HF BERT omitted; gather could be folded
    # into the kernel via scalar prefetch but is a single tiny op at these shapes.
    x = params["word_emb"][input_ids] + params["pos_emb"][None, :, :]
    x = _layer_norm(x, params["emb_gamma"], params["emb_beta"])
    x_flat = x.reshape(B * S, H)

    # Additive attention mask, built once: 0 for keep, -1e9 for pad.
    neg_mask = (1.0 - attention_mask.astype(jnp.float32)) * (-1e9)   # (B, S)

    logits = fused_forward(x_flat, neg_mask, params["w_attn"], params["w_ffn"],
                           params["vecs"], params["head_slab"])
    sentiment_logits = logits[:, :NUM_SENTIMENT]
    emotion_logits = logits[:, NUM_SENTIMENT:NUM_SENTIMENT + NUM_EMOTION]
    return sentiment_logits, emotion_logits


if __name__ == "__main__":
    root = jax.random.PRNGKey(0)
    pk, ik = jax.random.split(root)

    params = init_params(pk)
    input_ids = jax.random.randint(ik, (B, S), 0, VOCAB, dtype=jnp.int32)
    attention_mask = jnp.array(
        [[1, 1, 1, 1, 1, 1, 1, 1],
         [1, 1, 1, 1, 1, 0, 0, 0]], dtype=jnp.int32)

    fwd = jax.jit(multitask_forward)
    sentiment_logits, emotion_logits = fwd(params, input_ids, attention_mask)
    jax.block_until_ready((sentiment_logits, emotion_logits))

    assert sentiment_logits.shape == (B, NUM_SENTIMENT)
    assert emotion_logits.shape == (B, NUM_EMOTION)
    assert jnp.all(jnp.isfinite(sentiment_logits))
    assert jnp.all(jnp.isfinite(emotion_logits))
    print("KERNEL_OK")
</pallas_src>

<mosaic_0001>
module attributes {stable_mosaic.version = 11 : i64} {
  func.func @fused_layer_kernel(%arg0: i32, %arg1: memref<16x32xf32, #tpu.memory_space<vmem>>, %arg2: memref<2x8xf32, #tpu.memory_space<vmem>>, %arg3: memref<1x8x32x16xf32, #tpu.memory_space<vmem>>, %arg4: memref<1x2x32x64xf32, #tpu.memory_space<vmem>>, %arg5: memref<1x16x128xf32, #tpu.memory_space<vmem>>, %arg6: memref<40x128xf32, #tpu.memory_space<vmem>>, %arg7: memref<2x128xf32, #tpu.memory_space<vmem>>, %arg8: memref<16x32xf32, #tpu.memory_space<vmem>>) attributes {dimension_semantics = [#tpu.dimension_semantics<arbitrary>], iteration_bounds = array<i64: 2>, scalar_prefetch = 0 : i64, scratch_operands = 1 : i64, tpu.core_type = #tpu.core_type<tc>, window_params = [{pipeline_mode = #tpu.pipeline_mode<synchronous>, transform_indices = @transform_0, window_bounds = array<i64: 16, 32>}, {pipeline_mode = #tpu.pipeline_mode<synchronous>, transform_indices = @transform_1, window_bounds = array<i64: 2, 8>}, {transform_indices = @transform_2, window_bounds = array<i64: 1, 8, 32, 16>}, {transform_indices = @transform_3, window_bounds = array<i64: 1, 2, 32, 64>}, {transform_indices = @transform_4, window_bounds = array<i64: 1, 16, 128>}, {pipeline_mode = #tpu.pipeline_mode<synchronous>, transform_indices = @transform_5, window_bounds = array<i64: 40, 128>}, {pipeline_mode = #tpu.pipeline_mode<synchronous>, transform_indices = @transform_6, window_bounds = array<i64: 2, 128>}]} {
    %c0_i32 = arith.constant 0 : i32
    %0 = arith.cmpi eq, %arg0, %c0_i32 : i32
    %1 = arith.extui %0 : i1 to i32
    %c0_i32_0 = arith.constant 0 : i32
    %2 = arith.cmpi ne, %1, %c0_i32_0 : i32
    scf.if %2 {
      %c0_76 = arith.constant 0 : index
      %c0_77 = arith.constant 0 : index
      %175 = vector.load %arg1[%c0_76, %c0_77] : memref<16x32xf32, #tpu.memory_space<vmem>>, vector<16x32xf32>
      %c0_78 = arith.constant 0 : index
      %c0_79 = arith.constant 0 : index
      %176 = vector.load %arg8[%c0_78, %c0_79] : memref<16x32xf32, #tpu.memory_space<vmem>>, vector<16x32xf32>
      tpu.vector_store %arg8[%c0_78, %c0_79], %175 {strides = array<i32>} : memref<16x32xf32, #tpu.memory_space<vmem>>, vector<16x32xf32>,
    } else {
    }
    %c0 = arith.constant 0 : index
    %c0_1 = arith.constant 0 : index
    %3 = vector.load %arg8[%c0, %c0_1] : memref<16x32xf32, #tpu.memory_space<vmem>>, vector<16x32xf32>
    %c0_2 = arith.constant 0 : index
    %c0_3 = arith.constant 0 : index
    %4 = vector.load %arg2[%c0_2, %c0_3] : memref<2x8xf32, #tpu.memory_space<vmem>>, vector<2x8xf32>
    %5 = vector.shape_cast %4 : vector<2x8xf32> to vector<2x1x8xf32>
    %c0_4 = arith.constant 0 : index
    %c0_5 = arith.constant 0 : index
    %c0_6 = arith.constant 0 : index
    %6 = vector.load %arg5[%c0_4, %c0_5, %c0_6] : memref<1x16x128xf32, #tpu.memory_space<vmem>>, vector<1x16x128xf32>
    %7 = vector.shape_cast %6 : vector<1x16x128xf32> to vector<16x128xf32>
    %8 = vector.extract_strided_slice %7 {offsets = [0, 0], sizes = [1, 16], strides = [1, 1]} : vector<16x128xf32> to vector<1x16xf32>
    %9 = vector.extract_strided_slice %7 {offsets = [2, 0], sizes = [1, 16], strides = [1, 1]} : vector<16x128xf32> to vector<1x16xf32>
    %10 = vector.extract_strided_slice %7 {offsets = [4, 0], sizes = [1, 16], strides = [1, 1]} : vector<16x128xf32> to vector<1x16xf32>
    %c0_7 = arith.constant 0 : index
    %c0_8 = arith.constant 0 : index
    %c0_9 = arith.constant 0 : index
    %c0_10 = arith.constant 0 : index
    %11 = vector.load %arg3[%c0_7, %c0_8, %c0_9, %c0_10] : memref<1x8x32x16xf32, #tpu.memory_space<vmem>>, vector<1x1x32x16xf32>
    %12 = vector.shape_cast %11 : vector<1x1x32x16xf32> to vector<32x16xf32>
    %cst = arith.constant dense<0.000000e+00> : vector<16x16xf32>
    %13 = tpu.matmul %3, %12, %cst {dimension_numbers = #tpu.dot_dimension_numbers<[1], [0], [0], [1], [0, 0, 1, 1], [], []>} : vector<16x32xf32>, vector<32x16xf32>, vector<16x16xf32> -> vector<16x16xf32>
    %14 = vector.broadcast %8 : vector<1x16xf32> to vector<16x16xf32>
    %15 = arith.addf %13, %14 : vector<16x16xf32>
    %16 = vector.shape_cast %15 : vector<16x16xf32> to vector<2x8x16xf32>
    %c0_11 = arith.constant 0 : index
    %c2 = arith.constant 2 : index
    %c0_12 = arith.constant 0 : index
    %c0_13 = arith.constant 0 : index
    %17 = vector.load %arg3[%c0_11, %c2, %c0_12, %c0_13] : memref<1x8x32x16xf32, #tpu.memory_space<vmem>>, vector<1x1x32x16xf32>
    %18 = vector.shape_cast %17 : vector<1x1x32x16xf32> to vector<32x16xf32>
    %cst_14 = arith.constant dense<0.000000e+00> : vector<16x16xf32>
    %19 = tpu.matmul %3, %18, %cst_14 {dimension_numbers = #tpu.dot_dimension_numbers<[1], [0], [0], [1], [0, 0, 1, 1], [], []>} : vector<16x32xf32>, vector<32x16xf32>, vector<16x16xf32> -> vector<16x16xf32>
    %20 = vector.broadcast %9 : vector<1x16xf32> to vector<16x16xf32>
    %21 = arith.addf %19, %20 : vector<16x16xf32>
    %22 = vector.shape_cast %21 : vector<16x16xf32> to vector<2x8x16xf32>
    %c0_15 = arith.constant 0 : index
    %c4 = arith.constant 4 : index
    %c0_16 = arith.constant 0 : index
    %c0_17 = arith.constant 0 : index
    %23 = vector.load %arg3[%c0_15, %c4, %c0_16, %c0_17] : memref<1x8x32x16xf32, #tpu.memory_space<vmem>>, vector<1x1x32x16xf32>
    %24 = vector.shape_cast %23 : vector<1x1x32x16xf32> to vector<32x16xf32>
    %cst_18 = arith.constant dense<0.000000e+00> : vector<16x16xf32>
    %25 = tpu.matmul %3, %24, %cst_18 {dimension_numbers = #tpu.dot_dimension_numbers<[1], [0], [0], [1], [0, 0, 1, 1], [], []>} : vector<16x32xf32>, vector<32x16xf32>, vector<16x16xf32> -> vector<16x16xf32>
    %26 = vector.broadcast %10 : vector<1x16xf32> to vector<16x16xf32>
    %27 = arith.addf %25, %26 : vector<16x16xf32>
    %28 = vector.shape_cast %27 : vector<16x16xf32> to vector<2x8x16xf32>
    "tpu.trace_start"() <{level = 10 : i32, message = "bqd,bkd->bqk"}> : () -> ()
    %cst_19 = arith.constant dense<0.000000e+00> : vector<2x8x8xf32>
    %29 = tpu.matmul %16, %22, %cst_19 {dimension_numbers = #tpu.dot_dimension_numbers<[2], [2], [1], [1], [0, 0, 0, 1, 1, 1], [0], [0]>} : vector<2x8x16xf32>, vector<2x8x16xf32>, vector<2x8x8xf32> -> vector<2x8x8xf32>
    "tpu.trace_stop"() : () -> ()
    %cst_20 = arith.constant 2.500000e-01 : f32
    %30 = vector.broadcast %cst_20 : f32 to vector<2x8x8xf32>
    %31 = arith.mulf %29, %30 : vector<2x8x8xf32>
    %32 = vector.broadcast %5 : vector<2x1x8xf32> to vector<2x8x8xf32>
    %33 = arith.addf %31, %32 : vector<2x8x8xf32>
    %cst_21 = arith.constant dense<0xFF800000> : vector<2x8xf32>
    %34 = vector.multi_reduction <maximumf>, %33, %cst_21 [2] : vector<2x8x8xf32> to vector<2x8xf32>
    %35 = vector.shape_cast %34 : vector<2x8xf32> to vector<2x8x1xf32>
    %36 = vector.broadcast %35 : vector<2x8x1xf32> to vector<2x8x8xf32>
    %37 = arith.subf %33, %36 : vector<2x8x8xf32>
    %38 = math.exp %37 : vector<2x8x8xf32>
    %cst_22 = arith.constant dense<0.000000e+00> : vector<2x8xf32>
    %39 = vector.multi_reduction <add>, %38, %cst_22 [2] : vector<2x8x8xf32> to vector<2x8xf32>
    %40 = vector.shape_cast %39 : vector<2x8xf32> to vector<2x8x1xf32>
    %41 = vector.broadcast %40 : vector<2x8x1xf32> to vector<2x8x8xf32>
    %42 = arith.divf %38, %41 : vector<2x8x8xf32>
    "tpu.trace_start"() <{level = 10 : i32, message = "bqk,bkd->bqd"}> : () -> ()
    %cst_23 = arith.constant dense<0.000000e+00> : vector<2x8x16xf32>
    %43 = tpu.matmul %42, %28, %cst_23 {dimension_numbers = #tpu.dot_dimension_numbers<[2], [1], [1], [2], [0, 0, 0, 1, 1, 2], [0], [0]>} : vector<2x8x8xf32>, vector<2x8x16xf32>, vector<2x8x16xf32> -> vector<2x8x16xf32>
    "tpu.trace_stop"() : () -> ()
    %44 = vector.shape_cast %43 : vector<2x8x16xf32> to vector<16x16xf32>
    %c0_24 = arith.constant 0 : index
    %c6 = arith.constant 6 : index
    %c0_25 = arith.constant 0 : index
    %c0_26 = arith.constant 0 : index
    %45 = vector.load %arg3[%c0_24, %c6, %c0_25, %c0_26] : memref<1x8x32x16xf32, #tpu.memory_space<vmem>>, vector<1x1x32x16xf32>
    %46 = vector.shape_cast %45 : vector<1x1x32x16xf32> to vector<32x16xf32>
    %cst_27 = arith.constant dense<0.000000e+00> : vector<16x32xf32>
    %47 = tpu.matmul %44, %46, %cst_27 {dimension_numbers = #tpu.dot_dimension_numbers<[1], [1], [0], [0], [0, 0, 1, 0], [], []>} : vector<16x16xf32>, vector<32x16xf32>, vector<16x32xf32> -> vector<16x32xf32>
    %48 = vector.extract_strided_slice %7 {offsets = [1, 0], sizes = [1, 16], strides = [1, 1]} : vector<16x128xf32> to vector<1x16xf32>
    %49 = vector.extract_strided_slice %7 {offsets = [3, 0], sizes = [1, 16], strides = [1, 1]} : vector<16x128xf32> to vector<1x16xf32>
    %50 = vector.extract_strided_slice %7 {offsets = [5, 0], sizes = [1, 16], strides = [1, 1]} : vector<16x128xf32> to vector<1x16xf32>
    %c0_28 = arith.constant 0 : index
    %c1 = arith.constant 1 : index
    %c0_29 = arith.constant 0 : index
    %c0_30 = arith.constant 0 : index
    %51 = vector.load %arg3[%c0_28, %c1, %c0_29, %c0_30] : memref<1x8x32x16xf32, #tpu.memory_space<vmem>>, vector<1x1x32x16xf32>
    %52 = vector.shape_cast %51 : vector<1x1x32x16xf32> to vector<32x16xf32>
    %cst_31 = arith.constant dense<0.000000e+00> : vector<16x16xf32>
    %53 = tpu.matmul %3, %52, %cst_31 {dimension_numbers = #tpu.dot_dimension_numbers<[1], [0], [0], [1], [0, 0, 1, 1], [], []>} : vector<16x32xf32>, vector<32x16xf32>, vector<16x16xf32> -> vector<16x16xf32>
    %54 = vector.broadcast %48 : vector<1x16xf32> to vector<16x16xf32>
    %55 = arith.addf %53, %54 : vector<16x16xf32>
    %56 = vector.shape_cast %55 : vector<16x16xf32> to vector<2x8x16xf32>
    %c0_32 = arith.constant 0 : index
    %c3 = arith.constant 3 : index
    %c0_33 = arith.constant 0 : index
    %c0_34 = arith.constant 0 : index
    %57 = vector.load %arg3[%c0_32, %c3, %c0_33, %c0_34] : memref<1x8x32x16xf32, #tpu.memory_space<vmem>>, vector<1x1x32x16xf32>
    %58 = vector.shape_cast %57 : vector<1x1x32x16xf32> to vector<32x16xf32>
    %cst_35 = arith.constant dense<0.000000e+00> : vector<16x16xf32>
    %59 = tpu.matmul %3, %58, %cst_35 {dimension_numbers = #tpu.dot_dimension_numbers<[1], [0], [0], [1], [0, 0, 1, 1], [], []>} : vector<16x32xf32>, vector<32x16xf32>, vector<16x16xf32> -> vector<16x16xf32>
    %60 = vector.broadcast %49 : vector<1x16xf32> to vector<16x16xf32>
    %61 = arith.addf %59, %60 : vector<16x16xf32>
    %62 = vector.shape_cast %61 : vector<16x16xf32> to vector<2x8x16xf32>
    %c0_36 = arith.constant 0 : index
    %c5 = arith.constant 5 : index
    %c0_37 = arith.constant 0 : index
    %c0_38 = arith.constant 0 : index
    %63 = vector.load %arg3[%c0_36, %c5, %c0_37, %c0_38] : memref<1x8x32x16xf32, #tpu.memory_space<vmem>>, vector<1x1x32x16xf32>
    %64 = vector.shape_cast %63 : vector<1x1x32x16xf32> to vector<32x16xf32>
    %cst_39 = arith.constant dense<0.000000e+00> : vector<16x16xf32>
    %65 = tpu.matmul %3, %64, %cst_39 {dimension_numbers = #tpu.dot_dimension_numbers<[1], [0], [0], [1], [0, 0, 1, 1], [], []>} : vector<16x32xf32>, vector<32x16xf32>, vector<16x16xf32> -> vector<16x16xf32>
    %66 = vector.broadcast %50 : vector<1x16xf32> to vector<16x16xf32>
    %67 = arith.addf %65, %66 : vector<16x16xf32>
    %68 = vector.shape_cast %67 : vector<16x16xf32> to vector<2x8x16xf32>
    "tpu.trace_start"() <{level = 10 : i32, message = "bqd,bkd->bqk"}> : () -> ()
    %cst_40 = arith.constant dense<0.000000e+00> : vector<2x8x8xf32>
    %69 = tpu.matmul %56, %62, %cst_40 {dimension_numbers = #tpu.dot_dimension_numbers<[2], [2], [1], [1], [0, 0, 0, 1, 1, 1], [0], [0]>} : vector<2x8x16xf32>, vector<2x8x16xf32>, vector<2x8x8xf32> -> vector<2x8x8xf32>
    "tpu.trace_stop"() : () -> ()
    %cst_41 = arith.constant 2.500000e-01 : f32
    %70 = vector.broadcast %cst_41 : f32 to vector<2x8x8xf32>
    %71 = arith.mulf %69, %70 : vector<2x8x8xf32>
    %72 = vector.broadcast %5 : vector<2x1x8xf32> to vector<2x8x8xf32>
    %73 = arith.addf %71, %72 : vector<2x8x8xf32>
    %cst_42 = arith.constant dense<0xFF800000> : vector<2x8xf32>
    %74 = vector.multi_reduction <maximumf>, %73, %cst_42 [2] : vector<2x8x8xf32> to vector<2x8xf32>
    %75 = vector.shape_cast %74 : vector<2x8xf32> to vector<2x8x1xf32>
    %76 = vector.broadcast %75 : vector<2x8x1xf32> to vector<2x8x8xf32>
    %77 = arith.subf %73, %76 : vector<2x8x8xf32>
    %78 = math.exp %77 : vector<2x8x8xf32>
    %cst_43 = arith.constant dense<0.000000e+00> : vector<2x8xf32>
    %79 = vector.multi_reduction <add>, %78, %cst_43 [2] : vector<2x8x8xf32> to vector<2x8xf32>
    %80 = vector.shape_cast %79 : vector<2x8xf32> to vector<2x8x1xf32>
    %81 = vector.broadcast %80 : vector<2x8x1xf32> to vector<2x8x8xf32>
    %82 = arith.divf %78, %81 : vector<2x8x8xf32>
    "tpu.trace_start"() <{level = 10 : i32, message = "bqk,bkd->bqd"}> : () -> ()
    %cst_44 = arith.constant dense<0.000000e+00> : vector<2x8x16xf32>
    %83 = tpu.matmul %82, %68, %cst_44 {dimension_numbers = #tpu.dot_dimension_numbers<[2], [1], [1], [2], [0, 0, 0, 1, 1, 2], [0], [0]>} : vector<2x8x8xf32>, vector<2x8x16xf32>, vector<2x8x16xf32> -> vector<2x8x16xf32>
    "tpu.trace_stop"() : () -> ()
    %84 = vector.shape_cast %83 : vector<2x8x16xf32> to vector<16x16xf32>
    %c0_45 = arith.constant 0 : index
    %c7 = arith.constant 7 : index
    %c0_46 = arith.constant 0 : index
    %c0_47 = arith.constant 0 : index
    %85 = vector.load %arg3[%c0_45, %c7, %c0_46, %c0_47] : memref<1x8x32x16xf32, #tpu.memory_space<vmem>>, vector<1x1x32x16xf32>
    %86 = vector.shape_cast %85 : vector<1x1x32x16xf32> to vector<32x16xf32>
    %cst_48 = arith.constant dense<0.000000e+00> : vector<16x32xf32>
    %87 = tpu.matmul %84, %86, %cst_48 {dimension_numbers = #tpu.dot_dimension_numbers<[1], [1], [0], [0], [0, 0, 1, 0], [], []>} : vector<16x16xf32>, vector<32x16xf32>, vector<16x32xf32> -> vector<16x32xf32>
    %88 = arith.addf %47, %87 : vector<16x32xf32>
    %89 = vector.extract_strided_slice %7 {offsets = [6, 0], sizes = [1, 32], strides = [1, 1]} : vector<16x128xf32> to vector<1x32xf32>
    %90 = vector.broadcast %89 : vector<1x32xf32> to vector<16x32xf32>
    %91 = arith.addf %88, %90 : vector<16x32xf32>
    %92 = arith.addf %3, %91 : vector<16x32xf32>
    %93 = vector.extract_strided_slice %7 {offsets = [7, 0], sizes = [1, 32], strides = [1, 1]} : vector<16x128xf32> to vector<1x32xf32>
    %94 = vector.extract_strided_slice %7 {offsets = [8, 0], sizes = [1, 32], strides = [1, 1]} : vector<16x128xf32> to vector<1x32xf32>
    %cst_49 = arith.constant dense<0.000000e+00> : vector<16xf32>
    %95 = vector.multi_reduction <add>, %92, %cst_49 [1] : vector<16x32xf32> to vector<16xf32>
    %96 = vector.shape_cast %95 : vector<16xf32> to vector<16x1xf32>
    %cst_50 = arith.constant 3.200000e+01 : f32
    %97 = vector.broadcast %cst_50 : f32 to vector<16x1xf32>
    %98 = arith.divf %96, %97 : vector<16x1xf32>
    %99 = vector.broadcast %98 : vector<16x1xf32> to vector<16x32xf32>
    %100 = arith.subf %92, %99 : vector<16x32xf32>
    %101 = vector.broadcast %98 : vector<16x1xf32> to vector<16x32xf32>
    %102 = arith.subf %92, %101 : vector<16x32xf32>
    %103 = arith.mulf %100, %102 : vector<16x32xf32>
    %cst_51 = arith.constant dense<0.000000e+00> : vector<16xf32>
    %104 = vector.multi_reduction <add>, %103, %cst_51 [1] : vector<16x32xf32> to vector<16xf32>
    %105 = vector.shape_cast %104 : vector<16xf32> to vector<16x1xf32>
    %cst_52 = arith.constant 3.200000e+01 : f32
    %106 = vector.broadcast %cst_52 : f32 to vector<16x1xf32>
    %107 = arith.divf %105, %106 : vector<16x1xf32>
    %108 = vector.broadcast %98 : vector<16x1xf32> to vector<16x32xf32>
    %109 = arith.subf %92, %108 : vector<16x32xf32>
    %cst_53 = arith.constant 9.99999996E-13 : f32
    %110 = vector.broadcast %cst_53 : f32 to vector<16x1xf32>
    %111 = arith.addf %107, %110 : vector<16x1xf32>
    %112 = math.rsqrt %111 : vector<16x1xf32>
    %113 = vector.broadcast %112 : vector<16x1xf32> to vector<16x32xf32>
    %114 = arith.mulf %109, %113 : vector<16x32xf32>
    %115 = vector.broadcast %93 : vector<1x32xf32> to vector<16x32xf32>
    %116 = arith.mulf %114, %115 : vector<16x32xf32>
    %117 = vector.broadcast %94 : vector<1x32xf32> to vector<16x32xf32>
    %118 = arith.addf %116, %117 : vector<16x32xf32>
    %c0_54 = arith.constant 0 : index
    %c0_55 = arith.constant 0 : index
    %c0_56 = arith.constant 0 : index
    %c0_57 = arith.constant 0 : index
    %119 = vector.load %arg4[%c0_54, %c0_55, %c0_56, %c0_57] : memref<1x2x32x64xf32, #tpu.memory_space<vmem>>, vector<1x1x32x64xf32>
    %120 = vector.shape_cast %119 : vector<1x1x32x64xf32> to vector<32x64xf32>
    %cst_58 = arith.constant dense<0.000000e+00> : vector<16x64xf32>
    %121 = tpu.matmul %118, %120, %cst_58 {dimension_numbers = #tpu.dot_dimension_numbers<[1], [0], [0], [1], [0, 0, 1, 1], [], []>} : vector<16x32xf32>, vector<32x64xf32>, vector<16x64xf32> -> vector<16x64xf32>
    %122 = vector.extract_strided_slice %7 {offsets = [9, 0], sizes = [1, 64], strides = [1, 1]} : vector<16x128xf32> to vector<1x64xf32>
    %123 = vector.broadcast %122 : vector<1x64xf32> to vector<16x64xf32>
    %124 = arith.addf %121, %123 : vector<16x64xf32>
    %125 = arith.mulf %124, %124 : vector<16x64xf32>
    %126 = arith.mulf %124, %125 : vector<16x64xf32>
    %cst_59 = arith.constant 4.471500e-02 : f32
    %127 = vector.broadcast %cst_59 : f32 to vector<16x64xf32>
    %128 = arith.mulf %127, %126 : vector<16x64xf32>
    %129 = arith.addf %124, %128 : vector<16x64xf32>
    %cst_60 = arith.constant 0.797884583 : f32
    %130 = vector.broadcast %cst_60 : f32 to vector<16x64xf32>
    %131 = arith.mulf %130, %129 : vector<16x64xf32>
    %132 = math.tanh %131 : vector<16x64xf32>
    %cst_61 = arith.constant 1.000000e+00 : f32
    %133 = vector.broadcast %cst_61 : f32 to vector<16x64xf32>
    %134 = arith.addf %133, %132 : vector<16x64xf32>
    %cst_62 = arith.constant 5.000000e-01 : f32
    %135 = vector.broadcast %cst_62 : f32 to vector<16x64xf32>
    %136 = arith.mulf %135, %134 : vector<16x64xf32>
    %137 = arith.mulf %124, %136 : vector<16x64xf32>
    %c0_63 = arith.constant 0 : index
    %c1_64 = arith.constant 1 : index
    %c0_65 = arith.constant 0 : index
    %c0_66 = arith.constant 0 : index
    %138 = vector.load %arg4[%c0_63, %c1_64, %c0_65, %c0_66] : memref<1x2x32x64xf32, #tpu.memory_space<vmem>>, vector<1x1x32x64xf32>
    %139 = vector.shape_cast %138 : vector<1x1x32x64xf32> to vector<32x64xf32>
    %cst_67 = arith.constant dense<0.000000e+00> : vector<16x32xf32>
    %140 = tpu.matmul %137, %139, %cst_67 {dimension_numbers = #tpu.dot_dimension_numbers<[1], [1], [0], [0], [0, 0, 1, 0], [], []>} : vector<16x64xf32>, vector<32x64xf32>, vector<16x32xf32> -> vector<16x32xf32>
    %141 = vector.extract_strided_slice %7 {offsets = [10, 0], sizes = [1, 32], strides = [1, 1]} : vector<16x128xf32> to vector<1x32xf32>
    %142 = vector.broadcast %141 : vector<1x32xf32> to vector<16x32xf32>
    %143 = arith.addf %140, %142 : vector<16x32xf32>
    %144 = arith.addf %118, %143 : vector<16x32xf32>
    %145 = vector.extract_strided_slice %7 {offsets = [11, 0], sizes = [1, 32], strides = [1, 1]} : vector<16x128xf32> to vector<1x32xf32>
    %146 = vector.extract_strided_slice %7 {offsets = [12, 0], sizes = [1, 32], strides = [1, 1]} : vector<16x128xf32> to vector<1x32xf32>
    %cst_68 = arith.constant dense<0.000000e+00> : vector<16xf32>
    %147 = vector.multi_reduction <add>, %144, %cst_68 [1] : vector<16x32xf32> to vector<16xf32>
    %148 = vector.shape_cast %147 : vector<16xf32> to vector<16x1xf32>
    %cst_69 = arith.constant 3.200000e+01 : f32
    %149 = vector.broadcast %cst_69 : f32 to vector<16x1xf32>
    %150 = arith.divf %148, %149 : vector<16x1xf32>
    %151 = vector.broadcast %150 : vector<16x1xf32> to vector<16x32xf32>
    %152 = arith.subf %144, %151 : vector<16x32xf32>
    %153 = vector.broadcast %150 : vector<16x1xf32> to vector<16x32xf32>
    %154 = arith.subf %144, %153 : vector<16x32xf32>
    %155 = arith.mulf %152, %154 : vector<16x32xf32>
    %cst_70 = arith.constant dense<0.000000e+00> : vector<16xf32>
    %156 = vector.multi_reduction <add>, %155, %cst_70 [1] : vector<16x32xf32> to vector<16xf32>
    %157 = vector.shape_cast %156 : vector<16xf32> to vector<16x1xf32>
    %cst_71 = arith.constant 3.200000e+01 : f32
    %158 = vector.broadcast %cst_71 : f32 to vector<16x1xf32>
    %159 = arith.divf %157, %158 : vector<16x1xf32>
    %160 = vector.broadcast %150 : vector<16x1xf32> to vector<16x32xf32>
    %161 = arith.subf %144, %160 : vector<16x32xf32>
    %cst_72 = arith.constant 9.99999996E-13 : f32
    %162 = vector.broadcast %cst_72 : f32 to vector<16x1xf32>
    %163 = arith.addf %159, %162 : vector<16x1xf32>
    %164 = math.rsqrt %163 : vector<16x1xf32>
    %165 = vector.broadcast %164 : vector<16x1xf32> to vector<16x32xf32>
    %166 = arith.mulf %161, %165 : vector<16x32xf32>
    %167 = vector.broadcast %145 : vector<1x32xf32> to vector<16x32xf32>
    %168 = arith.mulf %166, %167 : vector<16x32xf32>
    %169 = vector.broadcast %146 : vector<1x32xf32> to vector<16x32xf32>
    %170 = arith.addf %168, %169 : vector<16x32xf32>
    %c0_73 = arith.constant 0 : index
    %c0_74 = arith.constant 0 : index
    %171 = vector.load %arg8[%c0_73, %c0_74] : memref<16x32xf32, #tpu.memory_space<vmem>>, vector<16x32xf32>
    tpu.vector_store %arg8[%c0_73, %c0_74], %170 {strides = array<i32>} : memref<16x32xf32, #tpu.memory_space<vmem>>, vector<16x32xf32>,
    %c1_i32 = arith.constant 1 : i32
    %172 = arith.cmpi eq, %arg0, %c1_i32 : i32
    %173 = arith.extui %172 : i1 to i32
    %c0_i32_75 = arith.constant 0 : i32
    %174 = arith.cmpi ne, %173, %c0_i32_75 : i32
    scf.if %174 {
      %c0_76 = arith.constant 0 : index
      %c0_77 = arith.constant 0 : index
      %175 = tpu.strided_load %arg8[%c0_76, %c0_77] {strides = array<i32: 8, 1>} : memref<16x32xf32, #tpu.memory_space<vmem>>, vector<2x32xf32>
      %c0_78 = arith.constant 0 : index
      %c0_79 = arith.constant 0 : index
      %176 = vector.load %arg6[%c0_78, %c0_79] : memref<40x128xf32, #tpu.memory_space<vmem>>, vector<40x128xf32>
      %177 = vector.extract_strided_slice %176 {offsets = [0, 0], sizes = [32, 128], strides = [1, 1]} : vector<40x128xf32> to vector<32x128xf32>
      %cst_80 = arith.constant dense<0.000000e+00> : vector<2x128xf32>
      %178 = tpu.matmul %175, %177, %cst_80 {dimension_numbers = #tpu.dot_dimension_numbers<[1], [0], [0], [1], [0, 0, 1, 1], [], []>} : vector<2x32xf32>, vector<32x128xf32>, vector<2x128xf32> -> vector<2x128xf32>
      %179 = vector.extract_strided_slice %176 {offsets = [32, 0], sizes = [1, 128], strides = [1, 1]} : vector<40x128xf32> to vector<1x128xf32>
      %180 = vector.broadcast %179 : vector<1x128xf32> to vector<2x128xf32>
      %181 = arith.addf %178, %180 : vector<2x128xf32>
      %c0_81 = arith.constant 0 : index
      %c0_82 = arith.constant 0 : index
      %182 = vector.load %arg7[%c0_81, %c0_82] : memref<2x128xf32, #tpu.memory_space<vmem>>, vector<2x128xf32>
      tpu.vector_store %arg7[%c0_81, %c0_82], %181 {strides = array<i32>} : memref<2x128xf32, #tpu.memory_space<vmem>>, vector<2x128xf32>,
    } else {
    }
    return
  }
  func.func @transform_0(%arg0: i32) -> (i32, i32) {
    %c0_i32 = arith.constant 0 : i32
    %c0_i32_0 = arith.constant 0 : i32
    %c0_i32_1 = arith.constant 0 : i32
    return %c0_i32, %c0_i32_0 : i32, i32
  }
  func.func @transform_1(%arg0: i32) -> (i32, i32) {
    %c0_i32 = arith.constant 0 : i32
    %c0_i32_0 = arith.constant 0 : i32
    %c0_i32_1 = arith.constant 0 : i32
    return %c0_i32, %c0_i32_0 : i32, i32
  }
  func.func @transform_2(%arg0: i32) -> (i32, i32, i32, i32) {
    %c0_i32 = arith.constant 0 : i32
    %c0_i32_0 = arith.constant 0 : i32
    %c0_i32_1 = arith.constant 0 : i32
    %c0_i32_2 = arith.constant 0 : i32
    return %arg0, %c0_i32, %c0_i32_0, %c0_i32_1 : i32, i32, i32, i32
  }
  func.func @transform_3(%arg0: i32) -> (i32, i32, i32, i32) {
    %c0_i32 = arith.constant 0 : i32
    %c0_i32_0 = arith.constant 0 : i32
    %c0_i32_1 = arith.constant 0 : i32
    %c0_i32_2 = arith.constant 0 : i32
    return %arg0, %c0_i32, %c0_i32_0, %c0_i32_1 : i32, i32, i32, i32
  }
  func.func @transform_4(%arg0: i32) -> (i32, i32, i32) {
    %c0_i32 = arith.constant 0 : i32
    %c0_i32_0 = arith.constant 0 : i32
    %c0_i32_1 = arith.constant 0 : i32
    return %arg0, %c0_i32, %c0_i32_0 : i32, i32, i32
  }
  func.func @transform_5(%arg0: i32) -> (i32, i32) {
    %c0_i32 = arith.constant 0 : i32
    %c0_i32_0 = arith.constant 0 : i32
    %c0_i32_1 = arith.constant 0 : i32
    return %c0_i32, %c0_i32_0 : i32, i32
  }
  func.func @transform_6(%arg0: i32) -> (i32, i32) {
    %c0_i32 = arith.constant 0 : i32
    %c0_i32_0 = arith.constant 0 : i32
    %c0_i32_1 = arith.constant 0 : i32
    return %c0_i32, %c0_i32_0 : i32, i32
  }
}

</mosaic_0001>

<bundles_post_ra>
// kernel: multitask_forward.1
= control target key start
LH: loop header
LB: loop body
LE: loop exit
PB: predicated region body
PF: predicated region fallthrough
CT: control target
= control target key end

     0   :  { %s2545_s21 = smov 0   ;;  %s2828_s0 = inlined_call_operand.vmem [shape: f32[16,32], index: 0, kind: input, shape index: {}]   ;;  %s2829_s1 = inlined_call_operand.vmem [shape: f32[2,8], index: 1, kind: input, shape index: {}]   ;;  %s2830_s2 = inlined_call_operand.vmem [shape: f32[2,8,32,16], index: 2, kind: input, shape index: {}]   ;;  %s2831_s3 = inlined_call_operand.vmem [shape: f32[2,2,32,64], index: 3, kind: input, shape index: {}]   ;;  %s2832_s4 = inlined_call_operand.vmem [shape: f32[2,16,128], index: 4, kind: input, shape index: {}]   ;;  %s2833_s5 = inlined_call_operand.vmem [shape: f32[40,128], index: 5, kind: input, shape index: {}]   ;;  %s2834_s6 = inlined_call_operand.vmem [shape: f32[2,128], index: 6, kind: output, shape index: {}]  }
   0x1 LB: > { %s2551_s22 = sadd.s32 4294967295, %s2503_s21   ;;  %p2122_p0 = scmp.ge.s32.totalorder %s2503_s21, 1  ;;  %s2503_s21 = sphi %s2545_s21, %s16_s21  }
   0x2   : > { %p227_p1 = scmp.lt.s32.totalorder %s2503_s21, 3 }
   0x4   : > { %p228_p2 = pnand %p2122_p0, %p227_p1 }
   0x5   : > { %p262_p3 = scmp.lt.s32.totalorder (!%p228_p2), %s2551_s22, 1  ;;  %p2129_p4 = scmp.ne.s32.totalorder (!%p228_p2), %s2551_s22, 0 }
   0x6   : > { %231 = sbr.rel (%p228_p2) target bundleno = 3101 (0xc1d), region = 44 }
   0xb   : > { %s263_s23 = scalar_select %p262_p3, %s2551_s22, 1 }
   0xc   : > { %280 = sbr.rel (%p2129_p4) target bundleno = 19 (0x13), region = 48 }
   0xd   : > { %s2211_s24 = sshll.u32 %s263_s23, 8  ;;  %s2212_s25 = sshll.u32 %s263_s23, 6 }
   0xe   : > { %s2560_s28 = scalar_lea.vmem %s2830_s2, %s2211_s24  ;;  %s2565_s7 = scalar_lea.vmem %s2831_s3, %s2212_s25 }
   0xf   : > { %s2213_s8 = sshll.u32 %s263_s23, 4 }
  0x10   : > { %s2570_s11 = scalar_lea.vmem %s2832_s4, %s2213_s8 }
  0x11   : > { %v281_v0 = vld [vmem:[%s2828_s0] sm:$0xff]  ;;  %vm283_vm0 = vcmask 261120   ;;  %v282_v1 = vld [vmem:[%s2828_s0 + $0x8] sm:$0xff] }
  0x12   : > { %284 = vst.msk [vmem:[#allocation2] sm:$0xff] %vm283_vm0, %v281_v0  ;;  %285 = vst.msk [vmem:[#allocation2 + $0x8] sm:$0xff] %vm283_vm0, %v282_v1 }
  0x13 PF: > { %v2136_v2 = vld [vmem:[%s2560_s28 + $0x58] sm:$0xff]  ;;  %v2135_v4 = vld [vmem:[%s2560_s28 + $0x50] sm:$0xff]  ;;  %v2134_v6 = vld [vmem:[%s2560_s28 + $0x48] sm:$0xff]  ;;  %vm322_vm1 = vcmask 261120   ;;  %v2505_v16 = vmov 0.0   ;;  %vm2506_vm2 = vmmov 0   ;;  %v301_v17 = vlaneseq }
  0x14   : > { %v317_v3 = vld [vmem:[%s2560_s28 + $0x18] sm:$0xff]  ;;  %2306 = vmatprep.subr.mxu1 %v2136_v2  ;;  %v316_v5 = vld [vmem:[%s2560_s28 + $0x10] sm:$0xff]  ;;  %v315_v7 = vld [vmem:[%s2560_s28 + $0x8] sm:$0xff]  ;;  %vm572_vm3 = vcmask 130048   ;;  %v2507_v38 = vmov 1966171168  }
  0x15   : > { %2295 = vmatprep.subr.mxu0 %v317_v3  ;;  %2307 = vmatpush3.msra.mxu1 %v2136_v2  ;;  %v2133_v8 = vld [vmem:[%s2560_s28 + $0x40] sm:$0xff]  ;;  %v2142_v12 = vld [vmem:[%s2560_s28 + $0x98] sm:$0xff]  ;;  %v2141_v13 = vld [vmem:[%s2560_s28 + $0x90] sm:$0xff]  ;;  %v2613_v18 = vshrl.u32 %v301_v17, 7  ;;  %v299_v39 = vunpack.c.l.s4 %v2507_v38  ;;  %vm739_vm4 = vcmask 64512   ;;  %vm1843_vm5 = vcmask 523264  }
  0x16   : > { %2296 = vmatpush3.msra.mxu0 %v317_v3  ;;  %2308 = vmatprep.subr.mxu1 %v2135_v4  ;;  %v314_v10 = vld [vmem:[%s2560_s28] sm:$0xff]  ;;  %v2140_v14 = vld [vmem:[%s2560_s28 + $0x88] sm:$0xff]  ;;  %v2157_v17 = vld [vmem:[%s2560_s28 + $0x30] sm:$0xff]  ;;  %p2207_p5 = scmp.ne.s32.totalorder %s2551_s22, 1 }
  0x17   : > { %2297 = vmatprep.subr.mxu0 %v316_v5  ;;  %2309 = vmatpush3.msra.mxu1 %v2135_v4  ;;  %v2139_v15 = vld [vmem:[%s2560_s28 + $0x80] sm:$0xff]  ;;  %v411_v19 = vsub.s32 2, %v2613_v18  ;;  %v2620_v21 = vsub.s32 0, %v2613_v18  ;;  %v495_v32 = vsub.s32 4, %v2613_v18  ;;  %v300_v40 = vunpack.c.0.s8 %v299_v39  ;;  %v2164_v4 = vld [vmem:[%s2560_s28 + $0x78] sm:$0xff] }
  0x18   : > { %2298 = vmatpush3.msra.mxu0 %v316_v5  ;;  %2310 = vmatprep.subr.mxu1 %v2134_v6  ;;  %v2617_v20 = vld [vmem:[%s2570_s11] sm:$0xff]  ;;  %v2158_v5 = vld [vmem:[%s2560_s28 + $0x38] sm:$0xff] }
  0x19   : > { %v2586_v9 = vld [vmem:[#allocation2] sm:$0xff]  ;;  %2299 = vmatprep.subr.mxu0 %v315_v7  ;;  %2311 = vmatpush3.msra.mxu1 %v2134_v6  ;;  %v2589_v11 = vld [vmem:[#allocation2 + $0x8] sm:$0xff]  ;;  %v412_v22 = vrot.slane %v2617_v20, %v411_v19  ;;  %v321_v23 = vrot.slane %v2617_v20, %v2620_v21  ;;  %v496_v33 = vrot.slane %v2617_v20, %v495_v32 }
  0x1a   : > { %2300 = vmatpush3.msra.mxu0 %v315_v7  ;;  %2312 = vmatprep.subr.mxu1 %v2133_v8  ;;  %v2130_v41 = vld.sshfl [vmem:[%s2829_s1] sm:$0x11 pattern:$0x75316420]  ;;  %v303_v43 = vsub.s32 %v300_v40, %v2613_v18 }
  0x1b   : > { %2314 = vmatprep.mubr.msk.f32.mxu1 %vm322_vm1, %v2586_v9  ;;  %2313 = vmatpush3.msra.mxu1 %v2133_v8  ;;  %v297_v42 = vcombine.high %v2130_v41, %v2130_v41 }
  0x1c   : > { %2301 = vmatprep.subr.mxu0 %v314_v10  ;;  %2315 = vmatmul.mubr.msk.f32.vlgmr.msra.gmra.mxu1 %vm322_vm1, %v2589_v11  ;;  %v304_v45 = vrot.slane %v2130_v41, %v303_v43 }
  0x1d   : > { %2302 = vmatpush3.msra.mxu0 %v314_v10  ;;  %2303 = vmatprep.mubr.msk.f32.mxu0 %vm322_vm1, %v2586_v9  ;;  %v311_v44 = vrot.slane %v297_v42, %v303_v43  ;;  %v2170_v42 = vld [vmem:[%s2560_s28 + $0xb8] sm:$0xff]  ;;  %v2169_v43 = vld [vmem:[%s2560_s28 + $0xb0] sm:$0xff] }
  0x1e   : > { %2317 = vmatprep.subr.mxu0 %v2142_v12  ;;  %2304 = vmatmul.mubr.msk.f32.vlgmr.msra.gmra.mxu0 %vm322_vm1, %v2589_v11  ;;  %v2649_v49 = vrot.slane %v304_v45, %v2620_v21  ;;  %v2167_v45 = vld [vmem:[%s2560_s28 + $0xa0] sm:$0xff] }
  0x1f   : > { %2318 = vmatpush3.msra.mxu0 %v2142_v12  ;;  %2325 = vmatprep.mubr.msk.f32.mxu0 %vm322_vm1, %v2586_v9  ;;  %v2646_v46 = vrot.slane %v311_v44, %v2620_v21  ;;  %v2163_v12 = vld [vmem:[%s2560_s28 + $0x70] sm:$0xff]  ;;  %v2168_v44 = vld [vmem:[%s2560_s28 + $0xa8] sm:$0xff] }
  0x20   : > { %2319 = vmatprep.subr.mxu0 %v2141_v13  ;;  %2333 = vmatprep.subr.mxu1 %v2505_v16 }
  0x21   : > { %2320 = vmatpush3.msra.mxu0 %v2141_v13  ;;  %2335 = vmatprep.mubr.msk.f32.mxu1 %vm2506_vm2, %v2505_v16 }
  0x22   : > { %2321 = vmatprep.subr.mxu0 %v2140_v14 }
  0x23   : > { %2322 = vmatpush3.msra.mxu0 %v2140_v14  ;;  %v2162_v14 = vld [vmem:[%s2560_s28 + $0x68] sm:$0xff] }
  0x24   : > { %2323 = vmatprep.subr.mxu0 %v2139_v15 }
  0x25   : > { %2324 = vmatpush3.msra.mxu0 %v2139_v15 }
  0x26   : > { %2326 = vmatmul.mubr.msk.f32.vlgmr.msra.gmra.mxu0 %vm322_vm1, %v2589_v11  ;;  %2328 = vmatprep.subr.mxu0 %v2505_v16 }
  0x27   : > { %2330 = vmatprep.mubr.msk.f32.mxu0 %vm2506_vm2, %v2505_v16 }
  0xdc   : > { %v2316_v24 = vpop.f32.mrf.mxu1 }
  0xdd   : > { %v485_v25 = vadd.f32 %v2316_v24, %v412_v22  ;;  %v2155_v24 = vld [vmem:[%s2560_s28 + $0x20] sm:$0xff] }
  0xde   : > { %v2305_v26 = vpop.f32.mrf.mxu0  ;;  %v479_v27 = vpop.f32.mrf.mxu1 }
  0xdf   : > { %v401_v28 = vadd.f32 %v2305_v26, %v321_v23  ;;  %v480_v29 = vadd.f32 %v479_v27, %v412_v22  ;;  %2334 = vmatpush3.xpose.msk.msra.mxu1 %vm572_vm3, %v485_v25  ;;  %v2161_v22 = vld [vmem:[%s2560_s28 + $0x60] sm:$0xff]  ;;  %v1004_v27 = vsub.s32 3, %v2613_v18 }
  0xe0   : > { %v395_v30 = vpop.f32.mrf.mxu0  ;;  %2343 = vmatprep.subr.mxu1 %v2505_v16 }
  0xe1   : > { %2329 = vmatpush3.xpose.msk.msra.mxu0 %vm572_vm3, %v480_v29  ;;  %v396_v31 = vadd.f32 %v395_v30, %v321_v23  ;;  %v2156_v23 = vld [vmem:[%s2560_s28 + $0x28] sm:$0xff]  ;;  %v1005_v30 = vrot.slane %v2617_v20, %v1004_v27 }
  0xe2   : > { %2336 = vmatmul.mubr.msk.f32.vlgmr.msra.gmra.mxu1 %vm572_vm3, %v401_v28  ;;  %2338 = vmatprep.subr.mxu0 %v2505_v16 }
  0xe3   : > { %2345 = vmatprep.mubr.msk.f32.mxu1 %vm2506_vm2, %v2505_v16 }
  0xe4   : > { %2331 = vmatmul.mubr.msk.f32.vlgmr.msra.gmra.mxu0 %vm572_vm3, %v396_v31 }
  0xe5   : > { %2340 = vmatprep.mubr.msk.f32.mxu0 %vm2506_vm2, %v2505_v16 }
  0xe6   : > { %v2327_v34 = vpop.f32.mrf.mxu0 }
  0xe7   : > { %v569_v35 = vadd.f32 %v2327_v34, %v496_v33 }
  0xe8   : > { %v563_v36 = vpop.f32.mrf.mxu0 }
  0xe9   : > { %v564_v37 = vadd.f32 %v563_v36, %v496_v33  ;;  %2344 = vmatpush3.msra.mxu1 %v569_v35  ;;  %v920_v33 = vsub.s32 1, %v2613_v18 }
  0xea   : > { %2359 = vmatprep.subr.mxu1 %v2164_v4 }
  0xeb   : > { %2339 = vmatpush3.msra.mxu0 %v564_v37  ;;  %v921_v37 = vrot.slane %v2617_v20, %v920_v33 }
  0xec   : > { %2348 = vmatprep.subr.mxu0 %v2158_v5 }
 0x1a2   : > { %v721_v47 = vpop.f32.mrf.mxu1 }
 0x1a3   : > { %v726_v48 = vmul.f32 0.25, %v721_v47 }
 0x1a4   : > { %v645_v50 = vpop.f32.mrf.mxu0  ;;  %v2337_v51 = vpop.f32.mrf.mxu1 }
 0x1a5   : > { %v725_v52 = vmul.f32 0.25, %v645_v50  ;;  %v738_v53 = vadd.f32 %v2646_v46, %v726_v48 }
 0x1a6   : > { %v2332_v54 = vpop.f32.mrf.mxu0 }
 0x1a7   : > { %v743_v55 = vsel %vm739_vm4, %v738_v53, -inf  ;;  %v737_v56 = vadd.f32 %v2649_v49, %v725_v52 }
 0x1a8   : > { %744 = vmax.xlane.f32.xlu0 %v743_v55 }
 0x1a9   : > { %v740_v57 = vsel %vm739_vm4, %v737_v56, -inf }
 0x1ac   : > { %741 = vmax.xlane.f32.xlu0 %v740_v57 }
 0x231   : > { %v745_v58 = vpop.xlane.xlu0 %744 }
 0x232   : > { %v747_v59 = vsub.f32 %v738_v53, %v745_v58 }
 0x234   : > { %v750_v60 = vmul.f32 1.442695, %v747_v59 }
 0x235   : > { %v742_v61 = vpop.xlane.xlu0 %741 }
 0x236   : > { %2469 = vpow2.f32 %v750_v60  ;;  %v746_v62 = vsub.f32 %v737_v56, %v742_v61 }
 0x238   : > { %v748_v63 = vmul.f32 1.442695, %v746_v62 }
 0x23a   : > { %2471 = vpow2.f32 %v748_v63 }
 0x243   : > { %v2470_v0 = vpop.eup %2469 }
 0x244   : > { %v755_v1 = vsel %vm739_vm4, %v2470_v0, 0.0 }
 0x245   : > { %756 = vadd.xlane.f32.xlu1 %v755_v1  ;;  %v1088_v1 = vsub.s32 5, %v2613_v18 }
 0x247   : > { %v2472_v2 = vpop.eup %2471 }
 0x248   : > { %v752_v3 = vsel %vm739_vm4, %v2472_v2, 0.0 }
 0x249   : > { %753 = vadd.xlane.f32.xlu1 %v752_v3  ;;  %v1089_v3 = vrot.slane %v2617_v20, %v1088_v1 }
 0x2ce   : > { %v757_v6 = vpop.xlane.xlu1 %756 }
 0x2cf   : > { %2473 = vrcp.f32 %v757_v6 }
 0x2d2   : > { %v754_v7 = vpop.xlane.xlu1 %753 }
 0x2d3   : > { %2475 = vrcp.f32 %v754_v7  ;;  %v2154_v7 = vld [vmem:[%s2560_s28 + $0xd8] sm:$0xff] }
 0x2dc   : > { %v2474_v8 = vpop.eup %2473 }
 0x2dd   : > { %v761_v10 = vmul.f32 %v2474_v8, %v2470_v0  ;;  %v2182_v8 = vld [vmem:[%s2560_s28 + $0xf8] sm:$0xff] }
 0x2df   : > { %2346 = vmatmul.mubr.msk.f32.vlgmr.msra.gmra.mxu1 %vm739_vm4, %v761_v10 }
 0x2e0   : > { %v2476_v13 = vpop.eup %2475  ;;  %2360 = vmatpush3.msra.mxu1 %v2164_v4  ;;  %2367 = vmatprep.mubr.msk.f32.mxu1 %vm322_vm1, %v2586_v9 }
 0x2e1   : > { %2361 = vmatprep.subr.mxu1 %v2163_v12  ;;  %v759_v15 = vmul.f32 %v2476_v13, %v2472_v2 }
 0x2e2   : > { %2362 = vmatpush3.msra.mxu1 %v2163_v12 }
 0x2e3   : > { %2363 = vmatprep.subr.mxu1 %v2162_v14  ;;  %2341 = vmatmul.mubr.msk.f32.vlgmr.msra.gmra.mxu0 %vm739_vm4, %v759_v15  ;;  %v2181_v15 = vld [vmem:[%s2560_s28 + $0xf0] sm:$0xff] }
 0x2e4   : > { %2349 = vmatpush3.msra.mxu0 %v2158_v5  ;;  %2364 = vmatpush3.msra.mxu1 %v2162_v14 }
 0x2e5   : > { %2350 = vmatprep.subr.mxu0 %v2157_v17  ;;  %2365 = vmatprep.subr.mxu1 %v2161_v22 }
 0x2e6   : > { %2351 = vmatpush3.msra.mxu0 %v2157_v17  ;;  %2366 = vmatpush3.msra.mxu1 %v2161_v22 }
 0x2e7   : > { %2352 = vmatprep.subr.mxu0 %v2156_v23  ;;  %2368 = vmatmul.mubr.msk.f32.vlgmr.msra.gmra.mxu1 %vm322_vm1, %v2589_v11 }
 0x2e8   : > { %2353 = vmatpush3.msra.mxu0 %v2156_v23  ;;  %2356 = vmatprep.mubr.msk.f32.mxu0 %vm322_vm1, %v2586_v9  ;;  %v2153_v23 = vld [vmem:[%s2560_s28 + $0xd0] sm:$0xff] }
 0x2e9   : > { %2354 = vmatprep.subr.mxu0 %v2155_v24  ;;  %2381 = vmatprep.subr.mxu1 %v2505_v16 }
 0x2ea   : > { %2355 = vmatpush3.msra.mxu0 %v2155_v24  ;;  %2383 = vmatprep.mubr.msk.f32.mxu1 %vm2506_vm2, %v2505_v16  ;;  %v2180_v24 = vld [vmem:[%s2560_s28 + $0xe8] sm:$0xff] }
 0x2eb   : > { %2357 = vmatmul.mubr.msk.f32.vlgmr.msra.gmra.mxu0 %vm322_vm1, %v2589_v11  ;;  %2370 = vmatprep.subr.mxu0 %v2170_v42 }
 0x2ec   : > { %2378 = vmatprep.mubr.msk.f32.mxu0 %vm322_vm1, %v2586_v9  ;;  %2371 = vmatpush3.msra.mxu0 %v2170_v42 }
 0x2ed   : > { %2372 = vmatprep.subr.mxu0 %v2169_v43 }
 0x2ee   : > { %2373 = vmatpush3.msra.mxu0 %v2169_v43 }
 0x2ef   : > { %2374 = vmatprep.subr.mxu0 %v2168_v44 }
 0x2f0   : > { %2375 = vmatpush3.msra.mxu0 %v2168_v44 }
 0x2f1   : > { %2376 = vmatprep.subr.mxu0 %v2167_v45 }
 0x2f2   : > { %2377 = vmatpush3.msra.mxu0 %v2167_v45 }
 0x2f3   : > { %2379 = vmatmul.mubr.msk.f32.vlgmr.msra.gmra.mxu0 %vm322_vm1, %v2589_v11  ;;  %2391 = vmatprep.subr.mxu0 %v2505_v16 }
 0x2f4   : > { %2393 = vmatprep.mubr.msk.f32.mxu0 %vm2506_vm2, %v2505_v16 }
 0x39f   : > { %v2680_v25 = vpop.f32.mrf.mxu1 }
 0x3a1   : > { %v2347_v26 = vpop.f32.mrf.mxu1 }
 0x3a2   : > { %v2152_v26 = vld [vmem:[%s2560_s28 + $0xc8] sm:$0xff] }
 0x3a3   : > { %v2683_v28 = vpop.f32.mrf.mxu0 }
 0x3a5   : > { %v2342_v29 = vpop.f32.mrf.mxu0 }
 0x3a6   : > { %v2151_v29 = vld [vmem:[%s2560_s28 + $0xc0] sm:$0xff] }
 0x3a7   : > { %v2369_v31 = vpop.f32.mrf.mxu1 }
 0x3a8   : > { %v1078_v40 = vadd.f32 %v2369_v31, %v1005_v30 }
 0x3a9   : > { %v1072_v34 = vpop.f32.mrf.mxu1 }
 0x3aa   : > { %v1073_v35 = vadd.f32 %v1072_v34, %v1005_v30 }
 0x3ab   : > { %v2358_v36 = vpop.f32.mrf.mxu0 }
 0x3ac   : > { %2382 = vmatpush3.xpose.msk.msra.mxu1 %vm572_vm3, %v1073_v35  ;;  %v994_v41 = vadd.f32 %v2358_v36, %v921_v37  ;;  %v1682_v36 = vsub.s32 6, %v2613_v18 }
 0x3ad   : > { %v988_v38 = vpop.f32.mrf.mxu0  ;;  %2386 = vmatprep.subr.mxu1 %v2505_v16 }
 0x3ae   : > { %v989_v39 = vadd.f32 %v988_v38, %v921_v37  ;;  %v1683_v38 = vrot.slane %v2617_v20, %v1682_v36 }
 0x3b0   : > { %2384 = vmatmul.mubr.msk.f32.vlgmr.msra.gmra.mxu1 %vm572_vm3, %v989_v39 }
 0x3b1   : > { %2387 = vmatpush3.xpose.msk.msra.mxu1 %vm572_vm3, %v1078_v40  ;;  %2388 = vmatprep.mubr.msk.f32.mxu1 %vm2506_vm2, %v2505_v16 }
 0x3b2   : > { %2396 = vmatprep.subr.mxu1 %v2505_v16 }
 0x3b3   : > { %v2380_v2 = vpop.f32.mrf.mxu0 }
 0x3b4   : > { %2389 = vmatmul.mubr.msk.f32.vlgmr.msra.gmra.mxu1 %vm572_vm3, %v994_v41  ;;  %v1162_v5 = vadd.f32 %v2380_v2, %v1089_v3  ;;  %v1717_v2 = vsub.s32 7, %v2613_v18 }
 0x3b5   : > { %2398 = vmatprep.mubr.msk.f32.mxu1 %vm2506_vm2, %v2505_v16  ;;  %v1156_v4 = vpop.f32.mrf.mxu0 }
 0x3b6   : > { %v1157_v6 = vadd.f32 %v1156_v4, %v1089_v3  ;;  %2397 = vmatpush3.msra.mxu1 %v1162_v5  ;;  %v1718_v4 = vrot.slane %v2617_v20, %v1717_v2  ;;  %v2766_v5 = vld [vmem:[%s2570_s11 + $0x8] sm:$0xff]  ;;  %v2200_v20 = vld [vmem:[%s2565_s7 + $0x38] sm:$0xff] }
 0x3b7   : > { %2412 = vmatprep.subr.msk.mxu1 %vm572_vm3, %v2154_v7 }
 0x3b8   : > { %2392 = vmatpush3.msra.mxu0 %v1157_v6 }
 0x3b9   : > { %2401 = vmatprep.subr.msk.mxu0 %vm572_vm3, %v2182_v8 }
 0x470   : > { %v1237_v47 = vpop.f32.mrf.mxu1 }
 0x471   : > { %v1317_v48 = vmul.f32 0.25, %v1237_v47 }
 0x472   : > { %v2385_v50 = vpop.f32.mrf.mxu1 }
 0x473   : > { %v1319_v51 = vadd.f32 %v1317_v48, %v2649_v49 }
 0x474   : > { %v1313_v52 = vpop.f32.mrf.mxu1 }
 0x475   : > { %v1318_v53 = vmul.f32 0.25, %v1313_v52  ;;  %v1321_v54 = vsel %vm739_vm4, %v1319_v51, -inf }
 0x476   : > { %1322 = vmax.xlane.f32.xlu0 %v1321_v54  ;;  %v2390_v55 = vpop.f32.mrf.mxu1 }
 0x477   : > { %v1320_v56 = vadd.f32 %v1318_v53, %v2646_v46 }
 0x479   : > { %v1324_v57 = vsel %vm739_vm4, %v1320_v56, -inf }
 0x47a   : > { %1325 = vmax.xlane.f32.xlu1 %v1324_v57 }
 0x4ff   : > { %v1323_v58 = vpop.xlane.xlu0 %1322 }
 0x500   : > { %v1327_v59 = vsub.f32 %v1319_v51, %v1323_v58 }
 0x502   : > { %v1329_v60 = vmul.f32 1.442695, %v1327_v59  ;;  %v1730_v59 = vld [vmem:[%s2565_s7 + $0x18] sm:$0xff] }
 0x503   : > { %v1326_v16 = vpop.xlane.xlu1 %1325 }
 0x504   : > { %2477 = vpow2.f32 %v1329_v60  ;;  %v1328_v61 = vsub.f32 %v1320_v56, %v1326_v16  ;;  %v1729_v60 = vld [vmem:[%s2565_s7 + $0x10] sm:$0xff]  ;;  %v1728_v16 = vld [vmem:[%s2565_s7 + $0x8] sm:$0xff] }
 0x506   : > { %v1331_v62 = vmul.f32 1.442695, %v1328_v61  ;;  %v1727_v61 = vld [vmem:[%s2565_s7] sm:$0xff] }
 0x508   : > { %2479 = vpow2.f32 %v1331_v62 }
 0x511   : > { %v2478_v49 = vpop.eup %2477 }
 0x512   : > { %v1333_v63 = vsel %vm739_vm4, %v2478_v49, 0.0 }
 0x513   : > { %1334 = vadd.xlane.f32.xlu0 %v1333_v63 }
 0x515   : > { %v2480_v0 = vpop.eup %2479 }
 0x516   : > { %v1336_v46 = vsel %vm739_vm4, %v2480_v0, 0.0 }
 0x517   : > { %1337 = vadd.xlane.f32.xlu1 %v1336_v46 }
 0x59c   : > { %v1335_v10 = vpop.xlane.xlu0 %1334 }
 0x59d   : > { %2481 = vrcp.f32 %v1335_v10 }
 0x5a0   : > { %v1338_v12 = vpop.xlane.xlu1 %1337 }
 0x5a1   : > { %2483 = vrcp.f32 %v1338_v12  ;;  %v1724_v12 = vrot.slane %v2766_v5, %v2620_v21 }
 0x5aa   : > { %v2482_v13 = vpop.eup %2481 }
 0x5ab   : > { %v1340_v14 = vmul.f32 %v2482_v13, %v2478_v49 }
 0x5ad   : > { %2394 = vmatmul.mubr.msk.f32.vlgmr.msra.gmra.mxu0 %vm739_vm4, %v1340_v14 }
 0x5ae   : > { %v2484_v17 = vpop.eup %2483  ;;  %2402 = vmatpush3.xpose.msk.msra.mxu0 %vm572_vm3, %v2182_v8 }
 0x5af   : > { %v1342_v22 = vmul.f32 %v2484_v17, %v2480_v0  ;;  %2403 = vmatprep.subr.msk.mxu0 %vm572_vm3, %v2181_v15  ;;  %v2199_v17 = vld [vmem:[%s2565_s7 + $0x30] sm:$0xff] }
 0x5b1   : > { %2399 = vmatmul.mubr.msk.f32.vlgmr.msra.gmra.mxu1 %vm739_vm4, %v1342_v22  ;;  %v2198_v22 = vld [vmem:[%s2565_s7 + $0x28] sm:$0xff] }
 0x5b2   : > { %2413 = vmatpush3.xpose.msk.msra.mxu1 %vm572_vm3, %v2154_v7  ;;  %2420 = vmatprep.mubr.msk.f32.mxu1 %vm572_vm3, %v2683_v28  ;;  %v2179_v28 = vld [vmem:[%s2560_s28 + $0xe0] sm:$0xff] }
 0x5b3   : > { %2414 = vmatprep.subr.msk.mxu1 %vm572_vm3, %v2153_v23  ;;  %2404 = vmatpush3.xpose.msk.msra.mxu0 %vm572_vm3, %v2181_v15 }
 0x5b4   : > { %2405 = vmatprep.subr.msk.mxu0 %vm572_vm3, %v2180_v24 }
 0x5b6   : > { %2415 = vmatpush3.xpose.msk.msra.mxu1 %vm572_vm3, %v2153_v23  ;;  %v2197_v23 = vld [vmem:[%s2565_s7 + $0x20] sm:$0xff] }
 0x5b7   : > { %2416 = vmatprep.subr.msk.mxu1 %vm572_vm3, %v2152_v26  ;;  %2406 = vmatpush3.xpose.msk.msra.mxu0 %vm572_vm3, %v2180_v24  ;;  %v1734_v24 = vrot.slane %v2766_v5, %v920_v33 }
 0x5b8   : > { %2407 = vmatprep.subr.msk.mxu0 %vm572_vm3, %v2179_v28 }
 0x5ba   : > { %2417 = vmatpush3.xpose.msk.msra.mxu1 %vm572_vm3, %v2152_v26 }
 0x5bb   : > { %2418 = vmatprep.subr.msk.mxu1 %vm572_vm3, %v2151_v29  ;;  %2408 = vmatpush3.xpose.msk.msra.mxu0 %vm572_vm3, %v2179_v28 }
 0x5bc   : > { %2423 = vmatprep.subr.mxu0 %v1730_v59 }
 0x5be   : > { %2419 = vmatpush3.xpose.msk.msra.mxu1 %vm572_vm3, %v2151_v29 }
 0x5bf   : > { %2434 = vmatprep.subr.msk.mxu1 %vm1843_vm5, %v2200_v20 }
 0x5c1   : > { %2421 = vmatmul.mubr.msk.f32.vlgmr.msra.gmra.mxu1 %vm572_vm3, %v2680_v25 }
 0x5c2   : > { %2435 = vmatpush3.xpose.msk.msra.mxu1 %vm1843_vm5, %v2200_v20 }
 0x5c3   : > { %2436 = vmatprep.subr.msk.mxu1 %vm1843_vm5, %v2199_v17 }
 0x5c6   : > { %2437 = vmatpush3.xpose.msk.msra.mxu1 %vm1843_vm5, %v2199_v17 }
 0x5c7   : > { %2438 = vmatprep.subr.msk.mxu1 %vm1843_vm5, %v2198_v22 }
 0x5ca   : > { %2439 = vmatpush3.xpose.msk.msra.mxu1 %vm1843_vm5, %v2198_v22 }
 0x5cb   : > { %2440 = vmatprep.subr.msk.mxu1 %vm1843_vm5, %v2197_v23 }
 0x5ce   : > { %2441 = vmatpush3.xpose.msk.msra.mxu1 %vm1843_vm5, %v2197_v23 }
 0x66d   : > { %v1412_v30 = vpop.f32.mrf.mxu0 }
 0x66e   : > { %2409 = vmatprep.mubr.msk.f32.mxu0 %vm572_vm3, %v1412_v30 }
 0x66f   : > { %v2395_v31 = vpop.f32.mrf.mxu0 }
 0x671   : > { %v1485_v34 = vpop.f32.mrf.mxu1 }
 0x672   : > { %2410 = vmatmul.mubr.msk.f32.vlgmr.msra.gmra.mxu0 %vm572_vm3, %v1485_v34 }
 0x673   : > { %v2400_v35 = vpop.f32.mrf.mxu1  ;;  %2424 = vmatpush3.msra.mxu0 %v1730_v59 }
 0x674   : > { %2425 = vmatprep.subr.mxu0 %v1729_v60 }
 0x675   : > { %2426 = vmatpush3.msra.mxu0 %v1729_v60 }
 0x676   : > { %2427 = vmatprep.subr.mxu0 %v1728_v16 }
 0x677   : > { %2428 = vmatpush3.msra.mxu0 %v1728_v16 }
 0x678   : > { %2429 = vmatprep.subr.mxu0 %v1727_v61 }
 0x679   : > { %2430 = vmatpush3.msra.mxu0 %v1727_v61 }
 0x681   : > { %v2422_v37 = vpop.f32.mrf.mxu1 }
 0x683   : > { %v1671_v40 = vpop.f32.mrf.mxu1 }
 0x732   : > { %v2411_v39 = vpop.f32.mrf.mxu0 }
 0x733   : > { %v1677_v25 = vadd.f32 %v2422_v37, %v2411_v39 }
 0x734   : > { %v1578_v41 = vpop.f32.mrf.mxu0 }
 0x735   : > { %v1685_v42 = vadd.f32 %v1683_v38, %v1677_v25  ;;  %v1672_v43 = vadd.f32 %v1671_v40, %v1578_v41 }
 0x737   : > { %v1684_v44 = vadd.f32 %v1683_v38, %v1672_v43  ;;  %v1687_v45 = vadd.f32 %v1685_v42, %v2589_v11 }
 0x739   : > { %v1691_v47 = vsel %vm322_vm1, %v1687_v45, 0.0  ;;  %v1686_v48 = vadd.f32 %v1684_v44, %v2586_v9 }
 0x73a   : > { %1692 = vadd.xlane.f32.xlu1 %v1691_v47 }
 0x73b   : > { %v1688_v50 = vsel %vm322_vm1, %v1686_v48, 0.0 }
 0x73c   : > { %1689 = vadd.xlane.f32.xlu0 %v1688_v50 }
 0x7c3   : > { %v1693_v51 = vpop.xlane.xlu1 %1692 }
 0x7c4   : > { %v1696_v52 = vmul.f32 0.03125, %v1693_v51  ;;  %v1842_v51 = vrot.slane %v2766_v5, %v411_v19 }
 0x7c5   : > { %v1690_v53 = vpop.xlane.xlu0 %1689 }
 0x7c6   : > { %v1698_v54 = vsub.f32 %v1687_v45, %v1696_v52  ;;  %v1695_v55 = vmul.f32 0.03125, %v1690_v53 }
 0x7c8   : > { %v1697_v56 = vsub.f32 %v1686_v48, %v1695_v55  ;;  %v1700_v57 = vmul.f32 %v1698_v54, %v1698_v54 }
 0x7ca   : > { %v1704_v11 = vsel %vm322_vm1, %v1700_v57, 0.0  ;;  %v1699_v58 = vmul.f32 %v1697_v56, %v1697_v56 }
 0x7cb   : > { %1705 = vadd.xlane.f32.xlu1 %v1704_v11 }
 0x7cc   : > { %v1701_v9 = vsel %vm322_vm1, %v1699_v58, 0.0 }
 0x7cd   : > { %1702 = vadd.xlane.f32.xlu0 %v1701_v9 }
 0x854   : > { %v1706_v62 = vpop.xlane.xlu1 %1705 }
 0x855   : > { %v1708_v49 = vmul.f32 0.03125, %v1706_v62 }
 0x856   : > { %v1703_v63 = vpop.xlane.xlu0 %1702 }
 0x857   : > { %v1710_v0 = vadd.f32 1e-12, %v1708_v49  ;;  %v1707_v46 = vmul.f32 0.03125, %v1703_v63 }
 0x859   : > { %2485 = vrsqrt.f32 %v1710_v0  ;;  %v1709_v1 = vadd.f32 1e-12, %v1707_v46 }
 0x85b   : > { %2487 = vrsqrt.f32 %v1709_v1 }
 0x866   : > { %v2486_v3 = vpop.eup %2485 }
 0x867   : > { %v1714_v6 = vmul.f32 %v2486_v3, %v1698_v54 }
 0x868   : > { %v2488_v7 = vpop.eup %2487 }
 0x869   : > { %v1713_v8 = vmul.f32 %v2488_v7, %v1697_v56  ;;  %v1720_v10 = vmul.f32 %v1718_v4, %v1714_v6  ;;  %v1968_v7 = vrot.slane %v2766_v5, %v1004_v27 }
 0x86b   : > { %v1719_v13 = vmul.f32 %v1718_v4, %v1713_v8  ;;  %v1726_v15 = vadd.f32 %v1724_v12, %v1720_v10  ;;  %v1974_v10 = vrot.slane %v2766_v5, %v495_v32 }
 0x86d   : > { %v1725_v14 = vadd.f32 %v1724_v12, %v1719_v13 }
 0x86f   : > { %2431 = vmatprep.mubr.msk.f32.mxu0 %vm322_vm1, %v1725_v14 }
 0x870   : > { %2432 = vmatmul.mubr.msk.f32.vlgmr.msra.gmra.mxu0 %vm322_vm1, %v1726_v15 }
 0x930   : > { %v2433_v26 = vpop.f32.mrf.mxu0 }
 0x931   : > { %v1813_v29 = vadd.f32 %v2433_v26, %v1734_v24 }
 0x932   : > { %v1807_v28 = vpop.f32.mrf.mxu0 }
 0x933   : > { %v1817_v30 = vmul.f32 %v1813_v29, %v1813_v29  ;;  %v1808_v31 = vadd.f32 %v1807_v28, %v1734_v24 }
 0x935   : > { %v1819_v34 = vmul.f32 %v1817_v30, %v1813_v29  ;;  %v1816_v35 = vmul.f32 %v1808_v31, %v1808_v31 }
 0x937   : > { %v1821_v36 = vmul.f32 0.044715, %v1819_v34  ;;  %v1818_v37 = vmul.f32 %v1816_v35, %v1808_v31 }
 0x939   : > { %v1823_v38 = vadd.f32 %v1821_v36, %v1813_v29  ;;  %v1820_v39 = vmul.f32 0.044715, %v1818_v37 }
 0x93b   : > { %v1825_v25 = vmul.f32 0.7978846, %v1823_v38  ;;  %v1822_v40 = vadd.f32 %v1820_v39, %v1808_v31 }
 0x93d   : > { %2489 = vtanh.f32 %v1825_v25  ;;  %v1824_v41 = vmul.f32 0.7978846, %v1822_v40 }
 0x93f   : > { %2491 = vtanh.f32 %v1824_v41 }
 0x94a   : > { %v2490_v42 = vpop.eup %2489 }
 0x94b   : > { %v1829_v43 = vadd.f32 1.0, %v2490_v42 }
 0x94c   : > { %v2492_v44 = vpop.eup %2491 }
 0x94d   : > { %v1828_v33 = vadd.f32 1.0, %v2492_v44  ;;  %v1831_v45 = vmul.f32 0.5, %v1829_v43 }
 0x94f   : > { %v1830_v47 = vmul.f32 0.5, %v1828_v33  ;;  %v1833_v50 = vmul.f32 %v1831_v45, %v1813_v29 }
 0x951   : > { %v1832_v48 = vmul.f32 %v1830_v47, %v1808_v31 }
 0x953   : > { %2442 = vmatprep.mubr.msk.f32.mxu1 %vm1843_vm5, %v1832_v48 }
 0x954   : > { %2443 = vmatmul.mubr.msk.f32.vlgmr.msra.gmra.mxu1 %vm1843_vm5, %v1833_v50 }
 0xa14   : > { %v2444_v52 = vpop.f32.mrf.mxu1 }
 0xa15   : > { %v1934_v53 = vadd.f32 %v2444_v52, %v1842_v51 }
 0xa16   : > { %v1928_v54 = vpop.f32.mrf.mxu1 }
 0xa17   : > { %v1929_v55 = vadd.f32 %v1928_v54, %v1842_v51  ;;  %v1938_v56 = vadd.f32 %v1934_v53, %v1726_v15 }
 0xa19   : > { %v1942_v57 = vsel %vm322_vm1, %v1938_v56, 0.0  ;;  %v1937_v11 = vadd.f32 %v1929_v55, %v1725_v14 }
 0xa1a   : > { %1943 = vadd.xlane.f32.xlu1 %v1942_v57 }
 0xa1b   : > { %v1939_v58 = vsel %vm322_vm1, %v1937_v11, 0.0 }
 0xa1c   : > { %1940 = vadd.xlane.f32.xlu0 %v1939_v58 }
 0xaa3   : > { %v1944_v9 = vpop.xlane.xlu1 %1943 }
 0xaa4   : > { %v1946_v59 = vmul.f32 0.03125, %v1944_v9 }
 0xaa5   : > { %v1941_v60 = vpop.xlane.xlu0 %1940 }
 0xaa6   : > { %v1948_v16 = vsub.f32 %v1938_v56, %v1946_v59  ;;  %v1945_v61 = vmul.f32 0.03125, %v1941_v60 }
 0xaa8   : > { %v1947_v62 = vsub.f32 %v1937_v11, %v1945_v61  ;;  %v1950_v49 = vmul.f32 %v1948_v16, %v1948_v16 }
 0xaaa   : > { %v1954_v19 = vsel %vm322_vm1, %v1950_v49, 0.0  ;;  %v1949_v63 = vmul.f32 %v1947_v62, %v1947_v62 }
 0xaab   : > { %1955 = vadd.xlane.f32.xlu1 %v1954_v19 }
 0xaac   : > { %v1951_v0 = vsel %vm322_vm1, %v1949_v63, 0.0 }
 0xaad   : > { %1952 = vadd.xlane.f32.xlu0 %v1951_v0 }
 0xb34   : > { %v1956_v46 = vpop.xlane.xlu1 %1955 }
 0xb35   : > { %v1958_v1 = vmul.f32 0.03125, %v1956_v46 }
 0xb36   : > { %v1953_v2 = vpop.xlane.xlu0 %1952 }
 0xb37   : > { %v1960_v3 = vadd.f32 1e-12, %v1958_v1  ;;  %v1957_v4 = vmul.f32 0.03125, %v1953_v2 }
 0xb39   : > { %2493 = vrsqrt.f32 %v1960_v3  ;;  %v1959_v6 = vadd.f32 1e-12, %v1957_v4 }
 0xb3b   : > { %2495 = vrsqrt.f32 %v1959_v6 }
 0xb46   : > { %v2494_v8 = vpop.eup %2493 }
 0xb47   : > { %v1964_v12 = vmul.f32 %v2494_v8, %v1948_v16 }
 0xb48   : > { %v2496_v13 = vpop.eup %2495 }
 0xb49   : > { %v1970_v14 = vmul.f32 %v1968_v7, %v1964_v12  ;;  %v1963_v15 = vmul.f32 %v2496_v13, %v1947_v62 }
 0xb4b   : > { %v1976_v20 = vadd.f32 %v1974_v10, %v1970_v14  ;;  %v1969_v17 = vmul.f32 %v1968_v7, %v1963_v15  ;;  %1982 = sbr.rel (%p2207_p5) target bundleno = 3101 (0xc1d), region = 52 }
 0xb4d   : > { %1978 = vst.msk [vmem:[#allocation2 + $0x8] sm:$0xff] %vm322_vm1, %v1976_v20  ;;  %v1975_v22 = vadd.f32 %v1974_v10, %v1969_v17 }
 0xb4f   : > { %1977 = vst.msk [vmem:[#allocation2] sm:$0xff] %vm322_vm1, %v1975_v22 }
 0xb50   : > { %v1987_v18 = vld [vmem:[%s2833_s5 + $0x18] sm:$0xff]  ;;  %v2508_v27 = vmov 0.0   ;;  %v1986_v32 = vld [vmem:[%s2833_s5 + $0x10] sm:$0xff]  ;;  %vm2509_vm6 = vmmov 0   ;;  %v1985_v5 = vld [vmem:[%s2833_s5 + $0x8] sm:$0xff] }
 0xb51   : > { %2445 = vmatprep.subr.mxu0 %v2508_v27  ;;  %2453 = vmatprep.mubr.msk.f32.mxu0 %vm2509_vm6, %v2508_v27  ;;  %v1984_v23 = vld [vmem:[%s2833_s5] sm:$0xff] }
 0xb52   : > { %2446 = vmatpush3.msra.mxu0 %v1987_v18  ;;  %v1988_v26 = vld [vmem:[%s2833_s5 + $0x20] sm:$0xff] }
 0xb53   : > { %2447 = vmatprep.subr.mxu0 %v2508_v27  ;;  %v1992_v29 = vrot.slane %v1988_v26, %v2620_v21 }
 0xb54   : > { %2448 = vmatpush3.msra.mxu0 %v1986_v32 }
 0xb55   : > { %2449 = vmatprep.subr.mxu0 %v2508_v27 }
 0xb56   : > { %2450 = vmatpush3.msra.mxu0 %v1985_v5  ;;  %v1983_v24 = vld [vmem:[#allocation2] ss:$8 sm:$0x3] }
 0xb57   : > { %2451 = vmatprep.subr.mxu0 %v2508_v27 }
 0xb58   : > { %2452 = vmatpush3.msra.mxu0 %v1984_v23 }
 0xb59   : > { %2454 = vmatmul.mubr.msk.f32.vlgmr.msra.gmra.mxu0 %vm322_vm1, %v1983_v24 }
 0xc19   : > { %v2062_v28 = vpop.f32.mrf.mxu0 }
 0xc1a   : > { %v2063_v30 = vadd.f32 %v2062_v28, %v1992_v29 }
 0xc1b   : > { %v2455_v31 = vpop.f32.mrf.mxu0 }
 0xc1c   : > { %2066 = vst [vmem:[%s2834_s6] sm:$0x3] %v2063_v30 }
 0xc1d PF: > { %s16_s21 = sadd.s32 1, %s2503_s21  }
 0xc1e   : > { %p13_p6 = scmp.ge.s32.totalorder %s16_s21, 4  }
 0xc20   :  { %15 = sbr.rel (!%p13_p6) target bundleno = 1 (0x1), region = 92 }

</bundles_post_ra>
